<compile_context>
chip_gen: v7x
topology: tpu7x:2x2x1
jax: 0.10.0
libtpu: 0.0.40
codegen_flags: <defaults>
</compile_context>

<pallas_src>
import functools

import jax
import jax.numpy as jnp
from jax.experimental import pallas as pl
from jax.experimental.pallas import tpu as pltpu


def _bbox_batch_iou_kernel(a_ref, bt_ref, o_ref, *, refine: bool):
    # a_ref : (TB, TN, 4)   tile of boxes A
    # bt_ref: (TB, 4, TM)   tile of boxes B (coordinate-major, lane-dense)
    # o_ref : (TB, TN, TM)  IoU output tile
    a = a_ref[...].astype(jnp.float32)
    bt = bt_ref[...].astype(jnp.float32)

    al, at, ar, ab_ = (a[:, :, k:k + 1] for k in range(4))    # (TB, TN, 1)
    bl, btp, br, bb = (bt[:, k:k + 1, :] for k in range(4))   # (TB, 1, TM)

    left = jnp.maximum(al, bl)        # (TB, TN, TM)
    right = jnp.minimum(ar, br)
    top = jnp.maximum(at, btp)
    bot = jnp.minimum(ab_, bb)

    # The fp16-max upper clamp (65504) from the half-precision origin is dead
    # work for f32 box coordinates in normal ranges -> keep only the lower clamp.
    iw = jnp.maximum(right - left, 0.0)
    ih = jnp.maximum(bot - top, 0.0)
    inter = iw * ih                   # (TB, TN, TM)

    area_a = (ar - al) * (ab_ - at)   # (TB, TN, 1)
    area_b = (br - bl) * (bb - btp)   # (TB, 1, TM)
    union = (area_a + area_b) - inter

    inv = pl.reciprocal(union, approx=True)      # EUP slot, ~free
    if refine:                                    # opt-in Newton step (<1e-6 rel)
        inv = inv * (2.0 - union * inv)
    o_ref[...] = (inter * inv).astype(o_ref.dtype)


def _round_up(x: int, m: int) -> int:
    return ((x + m - 1) // m) * m


def _adaptive_tile(dim: int, max_tile: int, align: int) -> int:
    """Smallest aligned tile with the same block count as max_tile would give."""
    nblk = pl.cdiv(dim, max_tile)
    return _round_up(pl.cdiv(dim, nblk), align)


def bbox_batch_iou(a: jax.Array, b: jax.Array, *,
                   out_dtype=None, refine_reciprocal: bool = False,
                   tn_max: int = 256, tm_max: int = 2048,
                   max_tile_bytes: int = 2 << 20) -> jax.Array:
    """a: (B, N, 4), b: (B, M, 4) -> (B, N, M) IoU (matches BBoxBatchIOU)."""
    B, N, _ = a.shape
    _, M, _ = b.shape
    out_dtype = jnp.dtype(a.dtype if out_dtype is None else out_dtype)
    if B == 0 or N == 0 or M == 0:
        return jnp.zeros((B, N, M), out_dtype)

    # Sublane alignment: 8 for 4-byte, 16 for 2-byte, 32 for 1-byte dtypes.
    sub_align = max(8,
                    32 // jnp.dtype(a.dtype).itemsize,
                    32 // out_dtype.itemsize)
    tn = _adaptive_tile(N, tn_max, sub_align)
    tm = _adaptive_tile(M, tm_max, 128)

    # Batch-block so each grid step carries ~max_tile_bytes of output, but keep
    # >= 2 grid steps when B >= 2 (v7x: two TensorCores share the grid).
    per_batch_bytes = tn * tm * out_dtype.itemsize
    tb = max(1, min(B, max_tile_bytes // max(per_batch_bytes, 1)))
    if B >= 2:
        tb = min(tb, max(1, B // 2))

    gb, gn, gm = pl.cdiv(B, tb), pl.cdiv(N, tn), pl.cdiv(M, tm)
    if gb * gn * gm == 1 and tm > 128:
        # B == 1 with a single tile: split M so both v7x TensorCores get work.
        tm = _round_up(pl.cdiv(tm, 2), 128)
        gm = pl.cdiv(M, tm)

    b_t = jnp.transpose(b, (0, 2, 1))   # (B, 4, M): tiny, lane-dense coords

    kernel = functools.partial(_bbox_batch_iou_kernel, refine=refine_reciprocal)
    return pl.pallas_call(
        kernel,
        out_shape=jax.ShapeDtypeStruct((B, N, M), out_dtype),
        grid=(gb, gn, gm),
        in_specs=[
            pl.BlockSpec((tb, tn, 4), lambda bi, i, j: (bi, i, 0)),   # A tile
            pl.BlockSpec((tb, 4, tm), lambda bi, i, j: (bi, 0, j)),   # B' tile
        ],
        out_specs=pl.BlockSpec((tb, tn, tm), lambda bi, i, j: (bi, i, j)),
        compiler_params=pltpu.CompilerParams(
            dimension_semantics=("parallel", "parallel", "parallel")),
    )(a, b_t)


# ----------------------------- test harness -----------------------------

def _make_boxes(key, B, N):
    """Deterministic valid corner boxes (l < r, t < b) in [0, 1]."""
    k1, k2 = jax.random.split(key)
    xy = jax.random.uniform(k1, (B, N, 2), dtype=jnp.float32, minval=0.0, maxval=0.6)
    wh = jax.random.uniform(k2, (B, N, 2), dtype=jnp.float32, minval=0.1, maxval=0.4)
    return jnp.concatenate([xy, xy + wh], axis=-1)   # [l, t, r, b]


def _reference_iou(a, b):
    al, at, ar, ab_ = [a[..., i] for i in range(4)]
    bl, bt_, br, bb = [b[..., i] for i in range(4)]
    left = jnp.maximum(al[..., :, None], bl[..., None, :])
    right = jnp.minimum(ar[..., :, None], br[..., None, :])
    top = jnp.maximum(at[..., :, None], bt_[..., None, :])
    bot = jnp.minimum(ab_[..., :, None], bb[..., None, :])
    iw = jnp.clip(right - left, 0.0, 65504.0)
    ih = jnp.clip(bot - top, 0.0, 65504.0)
    inter = iw * ih
    area_a = ((ar - al) * (ab_ - at))[..., :, None]
    area_b = ((br - bl) * (bb - bt_))[..., None, :]
    return inter / (area_a + area_b - inter)


if __name__ == "__main__":
    key = jax.random.PRNGKey(0)
    keys = jax.random.split(key, 6)

    # Case 1: module-scale shapes (B=2, N=8, M=8); exact-fit sublane tile,
    # partial 128-lane output tile (masked store path).
    B, N, M = 2, 8, 8
    a = _make_boxes(keys[0], B, N)
    b = _make_boxes(keys[1], B, M)
    out = jax.block_until_ready(bbox_batch_iou(a, b))
    ref = _reference_iou(a, b)
    assert out.shape == (B, N, M)
    assert jnp.allclose(out, ref, atol=5e-3, rtol=5e-3)   # approx reciprocal

    # Case 2: non-aligned N and M (partial edge blocks in both trailing dims).
    B2, N2, M2 = 2, 13, 37
    a2 = _make_boxes(keys[2], B2, N2)
    b2 = _make_boxes(keys[3], B2, M2)
    out2 = jax.block_until_ready(bbox_batch_iou(a2, b2))
    ref2 = _reference_iou(a2, b2)
    assert out2.shape == (B2, N2, M2)
    assert jnp.allclose(out2, ref2, atol=5e-3, rtol=5e-3)

    # Case 3: exercises the batch-blocked path (TB > 1, 3-D broadcasting).
    B3, N3, M3 = 4, 8, 8
    a3 = _make_boxes(keys[4], B3, N3)
    b3 = _make_boxes(keys[5], B3, M3)
    out3 = jax.block_until_ready(bbox_batch_iou(a3, b3))
    ref3 = _reference_iou(a3, b3)
    assert out3.shape == (B3, N3, M3)
    assert jnp.allclose(out3, ref3, atol=5e-3, rtol=5e-3)

    print("KERNEL_OK")
</pallas_src>

<mosaic_0001>
module attributes {stable_mosaic.version = 11 : i64} {
  func.func @_bbox_batch_iou_kernel(%arg0: i32, %arg1: i32, %arg2: i32, %arg3: memref<1x8x4xf32, #tpu.memory_space<vmem>>, %arg4: memref<1x4x128xf32, #tpu.memory_space<vmem>>, %arg5: memref<1x8x128xf32, #tpu.memory_space<vmem>>) attributes {dimension_semantics = [#tpu.dimension_semantics<parallel>, #tpu.dimension_semantics<parallel>, #tpu.dimension_semantics<parallel>], iteration_bounds = array<i64: 2, 1, 1>, scalar_prefetch = 0 : i64, scratch_operands = 0 : i64, tpu.core_type = #tpu.core_type<tc>, window_params = [{transform_indices = @transform_0, window_bounds = array<i64: 1, 8, 4>}, {transform_indices = @transform_1, window_bounds = array<i64: 1, 4, 128>}, {transform_indices = @transform_2, window_bounds = array<i64: 1, 8, 128>}]} {
    %c0 = arith.constant 0 : index
    %c0_0 = arith.constant 0 : index
    %c0_1 = arith.constant 0 : index
    %0 = vector.load %arg3[%c0, %c0_0, %c0_1] : memref<1x8x4xf32, #tpu.memory_space<vmem>>, vector<1x8x4xf32>
    %c0_2 = arith.constant 0 : index
    %c0_3 = arith.constant 0 : index
    %c0_4 = arith.constant 0 : index
    %1 = vector.load %arg4[%c0_2, %c0_3, %c0_4] : memref<1x4x128xf32, #tpu.memory_space<vmem>>, vector<1x4x128xf32>
    %2 = vector.extract_strided_slice %0 {offsets = [0, 0, 0], sizes = [1, 8, 1], strides = [1, 1, 1]} : vector<1x8x4xf32> to vector<1x8x1xf32>
    %3 = vector.extract_strided_slice %0 {offsets = [0, 0, 1], sizes = [1, 8, 1], strides = [1, 1, 1]} : vector<1x8x4xf32> to vector<1x8x1xf32>
    %4 = vector.extract_strided_slice %0 {offsets = [0, 0, 2], sizes = [1, 8, 1], strides = [1, 1, 1]} : vector<1x8x4xf32> to vector<1x8x1xf32>
    %5 = vector.extract_strided_slice %0 {offsets = [0, 0, 3], sizes = [1, 8, 1], strides = [1, 1, 1]} : vector<1x8x4xf32> to vector<1x8x1xf32>
    %6 = vector.extract_strided_slice %1 {offsets = [0, 0, 0], sizes = [1, 1, 128], strides = [1, 1, 1]} : vector<1x4x128xf32> to vector<1x1x128xf32>
    %7 = vector.extract_strided_slice %1 {offsets = [0, 1, 0], sizes = [1, 1, 128], strides = [1, 1, 1]} : vector<1x4x128xf32> to vector<1x1x128xf32>
    %8 = vector.extract_strided_slice %1 {offsets = [0, 2, 0], sizes = [1, 1, 128], strides = [1, 1, 1]} : vector<1x4x128xf32> to vector<1x1x128xf32>
    %9 = vector.extract_strided_slice %1 {offsets = [0, 3, 0], sizes = [1, 1, 128], strides = [1, 1, 1]} : vector<1x4x128xf32> to vector<1x1x128xf32>
    %10 = vector.broadcast %2 : vector<1x8x1xf32> to vector<1x8x128xf32>
    %11 = vector.broadcast %6 : vector<1x1x128xf32> to vector<1x8x128xf32>
    %12 = arith.maximumf %10, %11 : vector<1x8x128xf32>
    %13 = vector.broadcast %4 : vector<1x8x1xf32> to vector<1x8x128xf32>
    %14 = vector.broadcast %8 : vector<1x1x128xf32> to vector<1x8x128xf32>
    %15 = arith.minimumf %13, %14 : vector<1x8x128xf32>
    %16 = vector.broadcast %3 : vector<1x8x1xf32> to vector<1x8x128xf32>
    %17 = vector.broadcast %7 : vector<1x1x128xf32> to vector<1x8x128xf32>
    %18 = arith.maximumf %16, %17 : vector<1x8x128xf32>
    %19 = vector.broadcast %5 : vector<1x8x1xf32> to vector<1x8x128xf32>
    %20 = vector.broadcast %9 : vector<1x1x128xf32> to vector<1x8x128xf32>
    %21 = arith.minimumf %19, %20 : vector<1x8x128xf32>
    %22 = arith.subf %15, %12 : vector<1x8x128xf32>
    %cst = arith.constant 0.000000e+00 : f32
    %23 = vector.broadcast %cst : f32 to vector<1x8x128xf32>
    %24 = arith.maximumf %22, %23 : vector<1x8x128xf32>
    %25 = arith.subf %21, %18 : vector<1x8x128xf32>
    %cst_5 = arith.constant 0.000000e+00 : f32
    %26 = vector.broadcast %cst_5 : f32 to vector<1x8x128xf32>
    %27 = arith.maximumf %25, %26 : vector<1x8x128xf32>
    %28 = arith.mulf %24, %27 : vector<1x8x128xf32>
    %29 = arith.subf %4, %2 : vector<1x8x1xf32>
    %30 = arith.subf %5, %3 : vector<1x8x1xf32>
    %31 = arith.mulf %29, %30 : vector<1x8x1xf32>
    %32 = arith.subf %8, %6 : vector<1x1x128xf32>
    %33 = arith.subf %9, %7 : vector<1x1x128xf32>
    %34 = arith.mulf %32, %33 : vector<1x1x128xf32>
    %35 = vector.broadcast %31 : vector<1x8x1xf32> to vector<1x8x128xf32>
    %36 = vector.broadcast %34 : vector<1x1x128xf32> to vector<1x8x128xf32>
    %37 = arith.addf %35, %36 : vector<1x8x128xf32>
    %38 = arith.subf %37, %28 : vector<1x8x128xf32>
    %39 = tpu.reciprocal %38 {approx = true} : vector<1x8x128xf32> -> vector<1x8x128xf32>
    %40 = arith.mulf %28, %39 : vector<1x8x128xf32>
    %c0_6 = arith.constant 0 : index
    %c0_7 = arith.constant 0 : index
    %c0_8 = arith.constant 0 : index
    %41 = vector.load %arg5[%c0_6, %c0_7, %c0_8] : memref<1x8x128xf32, #tpu.memory_space<vmem>>, vector<1x8x128xf32>
    tpu.vector_store %arg5[%c0_6, %c0_7, %c0_8], %40 {strides = array<i32>} : memref<1x8x128xf32, #tpu.memory_space<vmem>>, vector<1x8x128xf32>,
    return
  }
  func.func @transform_0(%arg0: i32, %arg1: i32, %arg2: i32) -> (i32, i32, i32) {
    %c0_i32 = arith.constant 0 : i32
    %c0_i32_0 = arith.constant 0 : i32
    return %arg0, %arg1, %c0_i32 : i32, i32, i32
  }
  func.func @transform_1(%arg0: i32, %arg1: i32, %arg2: i32) -> (i32, i32, i32) {
    %c0_i32 = arith.constant 0 : i32
    %c0_i32_0 = arith.constant 0 : i32
    return %arg0, %c0_i32, %arg2 : i32, i32, i32
  }
  func.func @transform_2(%arg0: i32, %arg1: i32, %arg2: i32) -> (i32, i32, i32) {
    %c0_i32 = arith.constant 0 : i32
    return %arg0, %arg1, %arg2 : i32, i32, i32
  }
}

</mosaic_0001>

<bundles_post_ra>
// kernel: tpu_custom_call.1
= control target key start
LH: loop header
LB: loop body
LE: loop exit
PB: predicated region body
PF: predicated region fallthrough
CT: control target
= control target key end

     0   :  { %7 = vsyncpa [#allocation3], 0  ;;  %s680_s0 = inlined_call_operand.vmem [shape: f32[2,8,4], index: 0, kind: input, shape index: {}]   ;;  %s681_s1 = inlined_call_operand.vmem [shape: f32[2,4,8], index: 1, kind: input, shape index: {}]   ;;  %s682_s2 = inlined_call_operand.hbm [shape: f32[2,8,8], index: 2, kind: output, shape index: {}]  }
   0x1   :  { %9 = vsyncpa [#allocation3 + $0x1], 0  ;;  %s565_s9 = smov 0   ;;  %s567_s10 = smov 0  }
   0x2   :  { %s569_s11 = smov 0   ;;  %s571_s12 = smov 0  }
   0x3   :  { %s573_s13 = smov 0   ;;  %s575_s14 = smov 0  }
   0x4 LB: > { %s382_s15 = sadd.s32 4294967295, %s541_s14   ;;  %s383_s16 = sadd.s32 4294967294, %s541_s14   ;;  %s541_s14 = sphi %s575_s14, %s15_s14   ;;  %s537_s13 = sphi %s573_s13, %s689_s13   ;;  %s533_s12 = sphi %s571_s12, %s688_s12   ;;  %s529_s11 = sphi %s569_s11, %s687_s11   ;;  %s525_s10 = sphi %s567_s10, %s686_s10   ;;  %s521_s9 = sphi %s565_s9, %s685_s9  }
   0x5   : > { %s34_s17 = sadd.s32 1, %s537_s13  ;;  %s101_s18 = sadd.s32 1, %s529_s11 }
   0x6   : > { %p36_p0 = scmp.ge.s32.totalorder %s34_s17, 2  ;;  %p111_p1 = scmp.ne.s32.totalorder %s529_s11, %s525_s10 }
   0x7   : > { %p112_p2 = scmp.eq.s32.totalorder %s382_s15, 1  ;;  %p117_p3 = scmp.ne.s32.totalorder %s525_s10, %s521_s9 }
   0x8   : > { %s691_s17 = smov (%p36_p0, %s34_s17), 0  ;;  %p118_p5 = scmp.eq.s32.totalorder %s383_s16, 1 }
   0x9   : > { %p605_p4 = por %p112_p2, %p111_p1  ;;  %s94_s20 = ssub.s32 %s537_s13, %s691_s17 }
   0xa   : > { %p386_p6 = scmp.ge.s32.totalorder %s541_s14, 1  ;;  %p99_p7 = scmp.eq.s32.totalorder %s94_s20, 0 }
   0xb   : > { %p612_p8 = por %p118_p5, %p117_p3  ;;  %p156_p9 = scmp.lt.s32.totalorder %s541_s14, 3 }
   0xc   : > { %s618_s22 = scalar_select %p99_p7, %s529_s11, %s101_s18  }
   0xd   : > { %p157_p10 = pnand %p386_p6, %p156_p9 }
   0xe   : > { %p187_p11 = scmp.lt.s32.totalorder (!%p157_p10), %s533_s12, 1  ;;  %v543_v0 = vmov (!%p157_p10), 0   ;;  %v544_v1 = vmov (!%p157_p10), 1   ;;  %s545_s28 = smov (!%p157_p10), 2   ;;  %v546_v3 = vmov (!%p157_p10), 2   ;;  %v547_v4 = vmov (!%p157_p10), 3  }
   0xf   : > { %160 = sbr.rel (%p157_p10) target bundleno = 420 (0x1a4), region = 28  ;;  %455 = vset.pattern.permute.xlu1 (!%p157_p10), %v543_v0  ;;  %457 = vset.pattern.permute.xlu0 (!%p157_p10), %v544_v1  ;;  %s548_s29 = smov (!%p157_p10), 127   ;;  %v208_v9 = vlaneseq (!%p157_p10) }
  0x10   : > { %s184_s6 = sand.u32 (!%p157_p10), 1, %s525_s10   ;;  %s391_s8 = sshll.u32 (!%p157_p10), %s533_s12, 7 }
  0x11   : > { %v209_v11 = vshrl.u32 (!%p157_p10), %v208_v9, 7  ;;  %s387_s7 = sshll.u32 (!%p157_p10), %s184_s6, 3 }
  0x12   : > { %s186_s15 = scalar_lea.vmem (!%p157_p10), [#allocation2], %s387_s7 }
  0x13   : > { %v210_v13 = vsub.s32 (!%p157_p10), 0, %v209_v11  ;;  %v219_v15 = vsub.s32 (!%p157_p10), 2, %v209_v11  ;;  %v237_v16 = vsub.s32 (!%p157_p10), 3, %v209_v11  ;;  %v228_v17 = vsub.s32 (!%p157_p10), 1, %v209_v11  ;;  %s292_s16 = sshll.u32 (!%p157_p10), %s186_s15, 4  ;;  %s635_s16 = int_to_ptr.vmem [resolvable:$true] %s292_s16 }
  0x14   : > { %s463_s25 = scalar_lea.vmem (!%p157_p10), %s635_s16, 128 }
  0x15   : > { %p464_p12 = scmp.ne.s32.totalorder (!%p157_p10), %s635_s16, %s463_s25 }
  0x16   : > { %s188_s23 = scalar_select %p187_p11, %s533_s12, 1 }
  0x17   : > { %p465_p13 = pnand %p464_p12, %p605_p4  ;;  %s549_s12 = smov [#allocation2]  }
  0x18   : > { %s388_s24 = sshll.u32 %s188_s23, 3  ;;  %s389_s30 = sshll.u32 %s188_s23, 2 }
  0x19   : > { %s193_s27 = scalar_lea.vmem %s680_s0, %s388_s24  ;;  %s200_s5 = scalar_lea.vmem %s681_s1, %s389_s30 }
  0x1a   : > { %v201_v2 = vld [vmem:[%s193_s27] sm:$0xff]  ;;  %s633_s23 = scalar_lea.hbm %s682_s2, %s391_s8  ;;  %s277_s24 = scalar_lea.sflag [#allocation3], %s184_s6 }
  0x1b   : > { %245 = vrot.lane.b32.xlu0 %v201_v2, %s545_s28  ;;  %205 = vperm.xlu1 %455, %v201_v2   ;;  %v202_v12 = vld [vmem:[%s200_s5] sm:$0xf]  ;;  %p466_p0 = pneg %p465_p13  ;;  %s467_s26 = sshll.u32 %s549_s12, 4  ;;  %s468_s26 = int_to_ptr.vmem [resolvable:$false] %s467_s26 }
  0x1c   : > { %v255_v18 = vrot.slane %v202_v12, 6  ;;  %v211_v19 = vrot.slane %v202_v12, %v210_v13  ;;  %v220_v20 = vrot.slane %v202_v12, %v219_v15  ;;  %v238_v21 = vrot.slane %v202_v12, %v237_v16  ;;  %s469_s27 = scalar_lea.vmem %s468_s26, 256  ;;  %p470_p1 = scmp.lt.s32.totalorder %s635_s16, %s468_s26 }
  0x1d   : > { %v229_v22 = vrot.slane %v202_v12, %v228_v17  ;;  %p471_p2 = scmp.lt.s32.totalorder %s469_s27, %s463_s25 }
  0x1e   : > { %v257_v23 = vsub.f32 %v202_v12, %v255_v18 }
  0x1f   : > { %456 = vset.pattern.permute.xlu1 %v546_v3  ;;  %p472_p3 = por %p471_p2, %p470_p1 }
  0x20   : > { %214 = vperm.xlu1 %456, %v201_v2   ;;  %v259_v30 = vrot.slane %v257_v23, 1 }
  0x21   : > { %p473_p5 = pnand %p472_p3, %p466_p0 }
  0x22   : > { %v261_v33 = vmul.f32 %v259_v30, %v257_v23 }
  0x24   : > { %458 = vset.pattern.permute.xlu1 %v547_v4  ;;  %v270_v36 = vrot.slane %v261_v33, %v219_v15 }
  0x25   : > { %232 = vperm.xlu1 %458, %v201_v2  }
  0x29   : > { %459 = vset.pattern.permute.xlu1 %v546_v3 }
  0x8d   : > { %v246_v5 = vpop.permute.xlu0 %245 }
  0x8e   : > { %v248_v6 = vsub.f32 %v201_v2, %v246_v5 }
  0x90   : > { %250 = vrot.lane.b32.xlu0 %v248_v6, %s548_s29 }
  0x94   : > { %223 = vperm.xlu0 %457, %v201_v2  }
  0x98   : > { %460 = vset.pattern.permute.xlu0 %v546_v3 }
  0x9a   : > { %v206_v10 = vpop.permute.xlu1 %205 }
  0x9b   : > { %v212_v26 = vmax.f32 %v206_v10, %v211_v19 }
  0x9f   : > { %v215_v14 = vpop.permute.xlu1 %214 }
  0xa0   : > { %v221_v27 = vmin.f32 %v215_v14, %v220_v20 }
  0xa2   : > { %v240_v31 = vsub.f32 %v221_v27, %v212_v26 }
  0xa4   : > { %v233_v24 = vpop.permute.xlu1 %232  ;;  %v241_v34 = vmax.f32 %v240_v31, 0.0 }
  0xa5   : > { %v239_v28 = vmin.f32 %v233_v24, %v238_v21 }
 0x102   : > { %v251_v7 = vpop.permute.xlu0 %250 }
 0x103   : > { %v253_v8 = vmul.f32 %v251_v7, %v248_v6 }
 0x105   : > { %264 = vperm.xlu1 %459, %v253_v8  }
 0x113   : > { %v224_v25 = vpop.permute.xlu0 %223 }
 0x114   : > { %v230_v29 = vmax.f32 %v224_v25, %v229_v22 }
 0x116   : > { %v242_v32 = vsub.f32 %v239_v28, %v230_v29 }
 0x118   : > { %v243_v35 = vmax.f32 %v242_v32, 0.0 }
 0x11a   : > { %v244_v38 = vmul.f32 %v243_v35, %v241_v34 }
 0x184   : > { %v265_v37 = vpop.permute.xlu1 %264 }
 0x185   : > { %v271_v39 = vadd.f32 %v270_v36, %v265_v37 }
 0x187   : > { %v272_v40 = vsub.f32 %v271_v39, %v244_v38 }
 0x189   : > { %461 = vrcp.f32 %v272_v40 }
 0x193   : > { %v462_v41 = vpop.eup %461 }
 0x194   : > { %v274_v42 = vmul.f32 %v462_v41, %v244_v38 }
 0x196   : > { %275 = vst [vmem:[%s186_s15] sm:$0xff] %v274_v42 }
 0x197   : > { %476 = shalt.err (!%p473_p5)
}
 0x198   : > { %s477_s28 = scalar_lea.hbm %s633_s23, 128  ;;  %s481_s3 = scalar_lea.hbm %s682_s2, 256 }
 0x199   : > { %p478_p6 = scmp.ne.s32.totalorder %s633_s23, %s477_s28  ;;  %p482_p10 = scmp.lt.u32.totalorder %s633_s23, %s682_s2 }
 0x19a   : > { %p483_p11 = scmp.lt.u32.totalorder %s481_s3, %s477_s28  ;;  %p485_p13 = scmp.lt.u32.totalorder %s477_s28, %s633_s23 }
 0x19b   : > { %p479_p7 = pnand %p478_p6, %p605_p4 }
 0x19c   : > { %p484_p12 = por %p483_p11, %p482_p10 }
 0x19d   : > { %p480_p9 = pneg %p479_p7 }
 0x19e   : > { %p486_p0 = por %p485_p13, %p484_p12 }
 0x1a0   : > { %p487_p1 = pnand %p486_p0, %p480_p9 }
 0x1a2   : > { %490 = shalt.err (!%p487_p1)
}
 0x1a3   : > { %394 = dma.vmem_to_hbm [thread:$0]  (%p605_p4), %s635_s16, 128, %s633_s23, %s277_s24  }
 0x1a4 PF: > { %p400_p2 = scmp.ge.s32.totalorder %s541_s14, 2  ;;  %s304_s6 = sand.u32 1, %s521_s9  }
 0x1a5   : > { %s305_s7 = scalar_lea.sflag [#allocation3], %s304_s6 }
 0x1a6   : > { %p397_p3 = pnand %p400_p2, %p612_p8 }
 0x1a8   : > { %516 = dma.done.wait (!%p397_p3), %s305_s7, 128  }
 0x1a9   : > { %518 = vsyncadd (!%p397_p3), %s305_s7, 4294967168  ;;  %s15_s14 = sadd.s32 1, %s541_s14   ;;  %s685_s9 = smov %s525_s10 }
 0x1aa   : > { %p12_p5 = scmp.ge.s32.totalorder %s15_s14, 4   ;;  %s686_s10 = smov %s529_s11 }
 0x1ab   : > { %s687_s11 = smov %s618_s22  ;;  %s688_s12 = smov %s537_s13 }
 0x1ac   : > { %s689_s13 = smov %s691_s17  ;;  %14 = sbr.rel (!%p12_p5) target bundleno = 4 (0x4), region = 66 }
 0x1b3   :  { %310 = vsyncpa [#allocation3], 1 }
 0x1b4   :  { %312 = vsyncpa [#allocation3 + $0x1], 1 }

</bundles_post_ra>
